<compile_context>
chip_gen: v6e
topology: v6e:2x2x1
jax: 0.10.0
libtpu: 0.0.40
codegen_flags: <defaults>
</compile_context>

<pallas_src>
import math

import jax
import jax.numpy as jnp
from jax.experimental import pallas as pl
from jax.experimental.pallas import tpu as pltpu


_A = math.sqrt(2.0 / math.pi)          # sqrt(2/pi)
_B = _A * 0.044715                      # sqrt(2/pi) * 0.044715
_LANE = 128


def _gelu_kernel(x_ref, o_ref):
    # 0.5*x*(1 + tanh(sqrt(2/pi)*(x + 0.044715*x^3)))
    #   == 0.5*x*(1 + tanh(x*(A + B*x^2)))
    # f32 math: required on v5e (no bf16 VPU/EUP), accurate everywhere.
    # TODO(synk): profile-gated bf16-native compute on v6e/v7x if EUP binds.
    x = x_ref[...].astype(jnp.float32)
    inner = x * (_A + _B * x * x)
    o_ref[...] = (0.5 * x * (1.0 + jnp.tanh(inner))).astype(o_ref.dtype)


def _sublane_pack(dtype) -> int:
    # f32 -> 8, bf16/f16 -> 16, int8/fp8 -> 32 sublanes per vreg.
    itemsize = jnp.dtype(dtype).itemsize
    return max(8, 32 // max(1, itemsize))


def _round_up(x: int, m: int) -> int:
    return ((x + m - 1) // m) * m


def _budgets():
    """Generation-aware (block_bytes, vmem_limit_bytes); safe fallback."""
    block_bytes = 2 * 1024 * 1024
    vmem_limit = 32 * 1024 * 1024
    try:
        info = pltpu.get_tpu_info()
        vmem_cap = getattr(info, "vmem_capacity_bytes", None)
        if vmem_cap is not None:
            if vmem_cap <= 64 * 1024 * 1024:
                # v7x: 64 MiB VMEM, 3.2 TB/s HBM -> bigger blocks to bury the
                # per-step overhead; 4 x 6 MiB (in+out, double-buffered) = 24 MiB.
                block_bytes = 6 * 1024 * 1024
                vmem_limit = 40 * 1024 * 1024
            else:
                # v5e / v6e: 128 MiB VMEM; 4 MiB tiles are past the roofline knee.
                block_bytes = 4 * 1024 * 1024
                vmem_limit = 48 * 1024 * 1024
    except Exception:
        pass
    return block_bytes, vmem_limit


def _choose_tiles(rows, cols, itemsize, sub, block_bytes, outer_steps):
    """Pick (tm, bc, grid_rows, grid_cols) with padded-footprint budgeting."""
    padded_cols = _round_up(cols, _LANE)

    # Lane (column) blocking: keep full extent unless even a one-sublane-pack
    # tall block would already exceed the byte budget (physical, padded size).
    if padded_cols * sub * itemsize > block_bytes and cols > _LANE:
        bc = max(_LANE, (block_bytes // (sub * itemsize) // _LANE) * _LANE)
    else:
        bc = cols
    padded_bc = _round_up(bc, _LANE)

    # Sublane (row) blocking: fill the budget using the PHYSICAL footprint
    # (bc rounded up to 128 lanes), aligned to the dtype's sublane pack.
    tm_budget = max(sub, (block_bytes // (padded_bc * itemsize)) // sub * sub)
    tm = rows if tm_budget >= rows else tm_budget

    gr = pl.cdiv(rows, tm)
    gc = pl.cdiv(cols, bc)

    # Megacore (v7x, 2 TCs): if the array spans more than one block but the
    # outer parallel axis has only one step, split rows >=2-way so both cores
    # get work and DMA/compute pipelining exists.  Tiny single-block arrays
    # are left alone (splitting would only add per-step overhead).
    total_padded = _round_up(rows, sub) * padded_cols * itemsize
    if (gr == 1 and outer_steps <= 1 and total_padded > block_bytes
            and rows >= 2 * sub):
        tm = _round_up(pl.cdiv(rows, 2), sub)
        gr = pl.cdiv(rows, tm)
    return tm, bc, gr, gc


def gelu_pallas(x: jax.Array) -> jax.Array:
    """Applies the tanh-approx GELU elementwise via a Pallas TPU kernel."""
    orig_shape = x.shape
    dtype = x.dtype
    n = x.size
    if n == 0:
        return x

    itemsize = jnp.dtype(dtype).itemsize
    sub = _sublane_pack(dtype)
    block_bytes, vmem_limit = _budgets()

    if x.ndim >= 3 and orig_shape[-2] % sub != 0:
        # Collapsing a non-sublane-aligned second-to-last dim is NOT a free
        # metadata reshape on TPU's tiled layout -> keep the last two dims and
        # grid over the (always freely collapsible) leading dims instead.
        xv = x.reshape(-1, orig_shape[-2], orig_shape[-1])
        lead, rows, cols = xv.shape
        tm, bc, gr, gc = _choose_tiles(rows, cols, itemsize, sub, block_bytes, lead)
        grid = (lead, gr, gc)
        spec = pl.BlockSpec((1, tm, bc), lambda b, i, j: (b, i, j))
    else:
        if x.ndim >= 2:
            # Free collapse: dims before the tiled (sub, 128) pair, plus an
            # aligned second-to-last dim.
            xv = x.reshape(-1, orig_shape[-1])
        else:
            # 0-D / 1-D: prefer a lane- AND sublane-dense (R, k*128) view so
            # vregs stay full and stores are unmasked; fall back to (1, N)
            # only when nothing divides.
            width = 1
            for cand in (2048, 1024, 512, 256, 128):
                if n % cand == 0:
                    width = cand
                    break
            xv = x.reshape(-1, width) if width > 1 else x.reshape(1, -1)
        rows, cols = xv.shape
        tm, bc, gr, gc = _choose_tiles(rows, cols, itemsize, sub, block_bytes, 1)
        grid = (gr, gc)
        spec = pl.BlockSpec((tm, bc), lambda i, j: (i, j))

    cost = pl.CostEstimate(
        flops=10 * n,                      # ~8 VPU ops + mul/add around tanh
        transcendentals=n,                 # one tanh per element
        bytes_accessed=2 * n * itemsize,   # one read + one write
    )

    out = pl.pallas_call(
        _gelu_kernel,
        out_shape=jax.ShapeDtypeStruct(xv.shape, dtype),
        grid=grid,
        in_specs=[spec],
        out_specs=spec,
        compiler_params=pltpu.CompilerParams(
            dimension_semantics=("parallel",) * len(grid),
            vmem_limit_bytes=vmem_limit,
        ),
        cost_estimate=cost,
    )(xv)

    # Un-collapse (metadata-only by construction).
    return out.reshape(orig_shape)


def gelu_ref(x: jax.Array) -> jax.Array:
    """Pure-JAX reference matching the PyTorch module's forward exactly."""
    xf = x.astype(jnp.float32)
    y = 0.5 * xf * (1.0 + jnp.tanh(_A * (xf + 0.044715 * jnp.power(xf, 3))))
    return y.astype(x.dtype)


if __name__ == "__main__":
    key = jax.random.PRNGKey(0)
    k1, k2, k3, k4, k5 = jax.random.split(key, 5)

    cases = [
        # BERT-like activation, sublane-aligned -> free 2-D collapse path.
        (jax.random.normal(k1, (2, 8, 128), dtype=jnp.float32), 1e-5),
        # Misaligned second-to-last dim + narrow last dim -> 3-D path, masked edge.
        (jax.random.normal(k2, (2, 7, 32), dtype=jnp.float32), 1e-5),
        # bf16 input: f32 math inside the kernel, cast back on store.
        (jax.random.normal(k3, (2, 8, 128), dtype=jnp.bfloat16), 2e-2),
        # 1-D divisible by 128 -> lane/sublane-dense (3, 128) view.
        (jax.random.normal(k4, (384,), dtype=jnp.float32), 1e-5),
        # 1-D non-divisible -> (1, N) fallback.
        (jax.random.normal(k5, (100,), dtype=jnp.float32), 1e-5),
    ]

    for x, tol in cases:
        out = jax.block_until_ready(gelu_pallas(x))
        ref = gelu_ref(x)
        assert out.shape == x.shape and out.dtype == x.dtype
        assert jnp.allclose(
            out.astype(jnp.float32), ref.astype(jnp.float32), atol=tol, rtol=tol
        ), f"mismatch vs reference for shape {x.shape} dtype {x.dtype}"

    print("KERNEL_OK")
</pallas_src>

<mosaic_0001>
module attributes {stable_mosaic.version = 11 : i64} {
  func.func @_gelu_kernel(%arg0: i32, %arg1: i32, %arg2: memref<16x128xf32, #tpu.memory_space<vmem>>, %arg3: memref<16x128xf32, #tpu.memory_space<vmem>>) attributes {dimension_semantics = [#tpu.dimension_semantics<parallel>, #tpu.dimension_semantics<parallel>], iteration_bounds = array<i64: 1, 1>, scalar_prefetch = 0 : i64, scratch_operands = 0 : i64, tpu.core_type = #tpu.core_type<tc>, window_params = [{transform_indices = @transform_0, window_bounds = array<i64: 16, 128>}, {transform_indices = @transform_1, window_bounds = array<i64: 16, 128>}]} {
    %c0 = arith.constant 0 : index
    %c0_0 = arith.constant 0 : index
    %0 = vector.load %arg2[%c0, %c0_0] : memref<16x128xf32, #tpu.memory_space<vmem>>, vector<16x128xf32>
    %cst = arith.constant 0.0356774069 : f32
    %1 = vector.broadcast %cst : f32 to vector<16x128xf32>
    %2 = arith.mulf %1, %0 : vector<16x128xf32>
    %3 = arith.mulf %2, %0 : vector<16x128xf32>
    %cst_1 = arith.constant 0.797884583 : f32
    %4 = vector.broadcast %cst_1 : f32 to vector<16x128xf32>
    %5 = arith.addf %4, %3 : vector<16x128xf32>
    %6 = arith.mulf %0, %5 : vector<16x128xf32>
    %cst_2 = arith.constant 5.000000e-01 : f32
    %7 = vector.broadcast %cst_2 : f32 to vector<16x128xf32>
    %8 = arith.mulf %7, %0 : vector<16x128xf32>
    %9 = math.tanh %6 : vector<16x128xf32>
    %cst_3 = arith.constant 1.000000e+00 : f32
    %10 = vector.broadcast %cst_3 : f32 to vector<16x128xf32>
    %11 = arith.addf %10, %9 : vector<16x128xf32>
    %12 = arith.mulf %8, %11 : vector<16x128xf32>
    %c0_4 = arith.constant 0 : index
    %c0_5 = arith.constant 0 : index
    %13 = vector.load %arg3[%c0_4, %c0_5] : memref<16x128xf32, #tpu.memory_space<vmem>>, vector<16x128xf32>
    tpu.vector_store %arg3[%c0_4, %c0_5], %12 {strides = array<i32>} : memref<16x128xf32, #tpu.memory_space<vmem>>, vector<16x128xf32>,
    return
  }
  func.func @transform_0(%arg0: i32, %arg1: i32) -> (i32, i32) {
    %c0_i32 = arith.constant 0 : i32
    return %arg0, %arg1 : i32, i32
  }
  func.func @transform_1(%arg0: i32, %arg1: i32) -> (i32, i32) {
    %c0_i32 = arith.constant 0 : i32
    return %arg0, %arg1 : i32, i32
  }
}

</mosaic_0001>

<bundles_post_ra>
// kernel: tpu_custom_call.1
= control target key start
LH: loop header
LB: loop body
LE: loop exit
PB: predicated region body
PF: predicated region fallthrough
CT: control target
= control target key end

     0   :  { %6 = vsyncpa [#allocation3], 0  ;;  %s138_s0 = inlined_call_operand.hbm [shape: f32[16,128], index: 0, kind: input, shape index: {}]   ;;  %s139_s1 = inlined_call_operand.hbm [shape: f32[16,128], index: 1, kind: output, shape index: {}]  }
   0x1   :  { %7 = vsyncpa [#allocation4], 0  ;;  %s112_s6 = smov [#allocation2]  }
   0x2   :  { %s13_s7 = sshll.u32 %s112_s6, 4  ;;  %s14_s7 = int_to_ptr.vmem [resolvable:$true] %s13_s7 }
   0x3   :  { %s76_s8 = scalar_lea.vmem %s14_s7, 256  ;;  %p81_p1 = scmp.lt.s32.totalorder %s14_s7, %s14_s7 }
   0x4   :  { %p77_p0 = scmp.ne.s32.totalorder %s14_s7, %s76_s8  ;;  %p82_p2 = scmp.lt.s32.totalorder %s76_s8, %s76_s8 }
   0x6   :  { %p83_p3 = por %p82_p2, %p81_p1 }
   0x8   :  { %p84_p4 = pnand %p83_p3, %p77_p0 }
   0xa   :  { %87 = shalt.err (!%p84_p4)
}
   0xb   :  { %s113_s9 = smov 128   ;;  %s114_s10 = smov 8  }
   0xc   :  { %19 = dma.hbm_to_vmem [thread:$0]  %s138_s0, 256, %s14_s7, [#allocation3], %s113_s9, %s113_s9, %s114_s10  }
   0xd   :  { %108 = dma.done.wait [#allocation3], 256  }
   0xe   :  { %109 = vsyncadd [#allocation3], 4294967040  ;;  %v23_v0 = vld [vmem:[#allocation2] sm:$0xff]  ;;  %v24_v1 = vld [vmem:[#allocation2 + $0x8] sm:$0xff]  ;;  %s115_s0 = smov [#allocation5]  }
   0xf   :  { %v25_v2 = vmul.f32 0.035677407, %v23_v0  ;;  %v26_v3 = vmul.f32 0.035677407, %v24_v1  ;;  %v33_v10 = vmul.f32 0.5, %v23_v0  ;;  %v34_v12 = vmul.f32 0.5, %v24_v1 }
  0x10   :  { %s48_s13 = sshll.u32 %s115_s0, 4  ;;  %s49_s13 = int_to_ptr.vmem [resolvable:$true] %s48_s13 }
  0x11   :  { %v27_v4 = vmul.f32 %v25_v2, %v23_v0  ;;  %v28_v5 = vmul.f32 %v26_v3, %v24_v1  ;;  %s88_s14 = scalar_lea.vmem %s49_s13, 256  ;;  %p93_p6 = scmp.lt.s32.totalorder %s49_s13, %s49_s13 }
  0x12   :  { %p89_p5 = scmp.ne.s32.totalorder %s49_s13, %s88_s14  ;;  %p94_p7 = scmp.lt.s32.totalorder %s88_s14, %s88_s14 }
  0x13   :  { %v29_v6 = vadd.f32 0.7978846, %v27_v4  ;;  %v30_v7 = vadd.f32 0.7978846, %v28_v5 }
  0x14   :  { %p95_p8 = por %p94_p7, %p93_p6 }
  0x15   :  { %v31_v8 = vmul.f32 %v29_v6, %v23_v0  ;;  %v32_v9 = vmul.f32 %v30_v7, %v24_v1 }
  0x16   :  { %p96_p9 = pnand %p95_p8, %p89_p5 }
  0x17   :  { %64 = vtanh.f32 %v31_v8 }
  0x18   :  { %66 = vtanh.f32 %v32_v9 }
  0x24   :  { %v65_v11 = vpop.eup %64 }
  0x25   :  { %v67_v13 = vpop.eup %66  ;;  %v37_v14 = vadd.f32 1.0, %v65_v11 }
  0x26   :  { %v38_v15 = vadd.f32 1.0, %v67_v13 }
  0x27   :  { %v39_v16 = vmul.f32 %v37_v14, %v33_v10 }
  0x28   :  { %v40_v17 = vmul.f32 %v38_v15, %v34_v12 }
  0x29   :  { %41 = vst [vmem:[#allocation5] sm:$0xff] %v39_v16 }
  0x2a   :  { %42 = vst [vmem:[#allocation5 + $0x8] sm:$0xff] %v40_v17 }
  0x2b   :  { %99 = shalt.err (!%p96_p9)
}
  0x2c   :  { %54 = dma.vmem_to_hbm [thread:$0]  %s49_s13, 256, %s139_s1, [#allocation4], %s113_s9, %s113_s9, %s114_s10  }
  0x2d   :  { %110 = dma.done.wait [#allocation4], 256  }
  0x2e   :  { %111 = vsyncadd [#allocation4], 4294967040 }
  0x2f   :  { %58 = vsyncpa [#allocation3], 1 }
  0x30   :  { %59 = vsyncpa [#allocation4], 1 }

</bundles_post_ra>
